<compile_context>
chip_gen: v5e
topology: v5e:2x2
jax: 0.10.0
libtpu: 0.0.40
codegen_flags: <defaults>
</compile_context>

<pallas_src>
import jax
import jax.numpy as jnp
from jax.experimental import pallas as pl
from jax.experimental.pallas import tpu as pltpu


def adherence_kernel(xt_ref, w1t_ref, b1c_ref, w2t_ref, b2c_ref, w3c_ref, b3_ref, o_ref):
    # Layer 1: (64, D)bf16 @ (D, tb)bf16 -> (64, tb)f32.  Batch is on lanes.
    h1t = jnp.dot(w1t_ref[...], xt_ref[...], preferred_element_type=jnp.float32)
    h1t = jnp.maximum(h1t + b1c_ref[...], 0.0)                    # b1c: (64, 1) f32

    # Layer 2: (32, 64)bf16 @ (64, tb)bf16 -> (32, tb)f32.
    h2t = jnp.dot(w2t_ref[...], h1t.astype(jnp.bfloat16),
                  preferred_element_type=jnp.float32)
    h2t = jnp.maximum(h2t + b2c_ref[...], 0.0)                    # b2c: (32, 1) f32

    # Output layer (N=1): VPU multiply + sublane reduce -> lane-dense (1, tb).
    logits = jnp.sum(h2t * w3c_ref[...], axis=0, keepdims=True) + b3_ref[0]

    # Numerically robust sigmoid: one EUP push (tanh), no exp overflow.
    o_ref[...] = (0.5 * (jnp.tanh(0.5 * logits) + 1.0)).astype(o_ref.dtype)


def _round_up(n, m):
    return -(-n // m) * m


def _vmem_budget_bytes():
    """Generation-aware usable-VMEM budget (bytes)."""
    cap = None
    try:
        info = pltpu.get_tpu_info()
        for name in ("vmem_capacity_bytes", "vmem_size_bytes", "vmem_bytes"):
            v = getattr(info, name, None)
            if isinstance(v, int) and v > 0:
                cap = v
                break
    except Exception:
        cap = None
    if cap is None:
        cap = 64 * 2**20  # conservative fallback: v7x physical VMEM per TC
    # Leave headroom for Mosaic internal scratch; never ask for more than ~100 MiB
    # even on 128 MiB parts (v5e/v6e).  v7x: 64-16 = 48 MiB usable.
    return int(max(16 * 2**20, min(cap - 16 * 2**20, 100 * 2**20)))


def _bytes_per_row_estimate(D):
    """Conservative VMEM bytes per batch row for the transposed-x layout."""
    x_blk = 2 * (_round_up(D, 16) * 2)        # bf16 x tile, double-buffered
    o_blk = 2 * (8 * 4)                       # (1->8, tb) f32 output, double-buffered
    interm = 64 * 4 + 64 * 2 + 32 * 4 + 8 * 4  # h1t(f32) + h1t(bf16) + h2t + logits
    return x_blk + o_blk + interm + 512       # + margin for compiler temps


def _pick_batch_tile(B, D, budget):
    """Multiple-of-128 tile: as large as the VMEM budget allows (cap 32768),
    but split so there are >= 2 grid steps when the batch has enough rows."""
    cap = max(128, min((budget // _bytes_per_row_estimate(D)) // 128 * 128, 32768))
    rows = _round_up(B, 128)
    if rows < 256:
        return 128
    return int(max(128, min(cap, _round_up(rows, 256) // 2)))


def adherence_net_forward(x, params, *, batch_tile=None):
    """x: (B, input_dim) float32.  params: w1(D,64) b1(1,64) w2(64,32) b2(1,32) w3(32,1) b3(1,1)."""
    B, D = x.shape
    w1t = params["w1"].T.astype(jnp.bfloat16)          # (64, D)
    b1c = params["b1"].reshape(-1, 1).astype(jnp.float32)   # (64, 1)
    w2t = params["w2"].T.astype(jnp.bfloat16)          # (32, 64)
    b2c = params["b2"].reshape(-1, 1).astype(jnp.float32)   # (32, 1)
    w3c = params["w3"].astype(jnp.float32)              # (32, 1)
    b3 = params["b3"].reshape(-1).astype(jnp.float32)   # (1,) -> SMEM scalar

    budget = _vmem_budget_bytes()
    tb = batch_tile if batch_tile is not None else _pick_batch_tile(B, D, budget)
    assert tb % 128 == 0, "batch_tile must be a multiple of 128 (lane-dense tiles)"

    n_tiles = pl.cdiv(B, tb)
    Bp = n_tiles * tb
    xp = x if Bp == B else jnp.pad(x, ((0, Bp - B), (0, 0)))
    # Layout plumbing in the wrapper: batch on lanes, bf16 HBM stream.
    xt = xp.T.astype(jnp.bfloat16)                       # (D, Bp)

    out = pl.pallas_call(
        adherence_kernel,
        out_shape=jax.ShapeDtypeStruct((1, Bp), jnp.float32),
        grid_spec=pltpu.PrefetchScalarGridSpec(
            num_scalar_prefetch=0,
            grid=(n_tiles,),
            in_specs=[
                # x tile: batch on the lane axis; D is the full (un-padded) dim.
                # (Optionally pipeline_mode=pl.Buffered(3) here if v5e profiling
                #  shows exposed x DMA.)
                pl.BlockSpec((D, tb), lambda i: (0, i)),
                pl.BlockSpec(w1t.shape, lambda i: (0, 0)),   # constants: full blocks
                pl.BlockSpec(b1c.shape, lambda i: (0, 0)),
                pl.BlockSpec(w2t.shape, lambda i: (0, 0)),
                pl.BlockSpec(b2c.shape, lambda i: (0, 0)),
                pl.BlockSpec(w3c.shape, lambda i: (0, 0)),
                pl.BlockSpec(memory_space=pltpu.MemorySpace.SMEM),  # b3 scalar
            ],
            out_specs=pl.BlockSpec((1, tb), lambda i: (0, i)),      # lane-dense row
        ),
        compiler_params=pltpu.CompilerParams(
            dimension_semantics=("parallel",),
            vmem_limit_bytes=int(budget),
        ),
    )(xt, w1t, b1c, w2t, b2c, w3c, b3)

    # Layout plumbing only: (1, Bp) -> (B, 1).
    return out[0, :B].reshape(B, 1)


def init_params(input_dim, key):
    """Deterministic synthetic parameters (shapes match AdherenceNet.__init__)."""
    k1, k2, k3, k4, k5, k6 = jax.random.split(key, 6)
    scale = 0.1
    return {
        "w1": scale * jax.random.normal(k1, (input_dim, 64), jnp.float32),
        "b1": scale * jax.random.normal(k2, (1, 64), jnp.float32),
        "w2": scale * jax.random.normal(k3, (64, 32), jnp.float32),
        "b2": scale * jax.random.normal(k4, (1, 32), jnp.float32),
        "w3": scale * jax.random.normal(k5, (32, 1), jnp.float32),
        "b3": scale * jax.random.normal(k6, (1, 1), jnp.float32),
    }


def reference_forward(x, p):
    h = jnp.maximum(x @ p["w1"] + p["b1"], 0.0)
    h = jnp.maximum(h @ p["w2"] + p["b2"], 0.0)
    return jax.nn.sigmoid(h @ p["w3"] + p["b3"])


if __name__ == "__main__":
    key = jax.random.PRNGKey(0)
    kx, kp = jax.random.split(key)

    # Small but non-trivial: exercises padding (300 -> 512) and a 2-step grid.
    batch, input_dim = 300, 16
    x = jax.random.normal(kx, (batch, input_dim), jnp.float32)
    params = init_params(input_dim, kp)

    out = adherence_net_forward(x, params)
    out = jax.block_until_ready(out)

    ref = reference_forward(x, params)
    assert out.shape == (batch, 1)
    # bf16 MXU operands (f32 accumulation) + f32 tanh sigmoid: measured error is
    # ~1e-3 on these scales; 5e-3 abs/rel is far tighter than any layout/weight
    # bug would allow.
    assert jnp.allclose(out, ref, atol=5e-3, rtol=5e-3), "mismatch vs reference"

    print("KERNEL_OK")
</pallas_src>

<mosaic_0001>
module attributes {stable_mosaic.version = 11 : i64} {
  func.func @adherence_kernel(%arg0: i32, %arg1: memref<16x256xbf16, #tpu.memory_space<vmem>>, %arg2: memref<64x16xbf16, #tpu.memory_space<vmem>>, %arg3: memref<64x1xf32, #tpu.memory_space<vmem>>, %arg4: memref<32x64xbf16, #tpu.memory_space<vmem>>, %arg5: memref<32x1xf32, #tpu.memory_space<vmem>>, %arg6: memref<32x1xf32, #tpu.memory_space<vmem>>, %arg7: memref<1xf32, #tpu.memory_space<smem>>, %arg8: memref<1x256xf32, #tpu.memory_space<vmem>>) attributes {dimension_semantics = [#tpu.dimension_semantics<parallel>], iteration_bounds = array<i64: 2>, scalar_prefetch = 0 : i64, scratch_operands = 0 : i64, tpu.core_type = #tpu.core_type<tc>, window_params = [{transform_indices = @transform_0, window_bounds = array<i64: 16, 256>}, {pipeline_mode = #tpu.pipeline_mode<synchronous>, transform_indices = @transform_1, window_bounds = array<i64: 64, 16>}, {pipeline_mode = #tpu.pipeline_mode<synchronous>, transform_indices = @transform_2, window_bounds = array<i64: 64, 1>}, {pipeline_mode = #tpu.pipeline_mode<synchronous>, transform_indices = @transform_3, window_bounds = array<i64: 32, 64>}, {pipeline_mode = #tpu.pipeline_mode<synchronous>, transform_indices = @transform_4, window_bounds = array<i64: 32, 1>}, {pipeline_mode = #tpu.pipeline_mode<synchronous>, transform_indices = @transform_5, window_bounds = array<i64: 32, 1>}, {transform_indices = @transform_6, window_bounds = array<i64: 1>}, {transform_indices = @transform_7, window_bounds = array<i64: 1, 256>}]} {
    %c0 = arith.constant 0 : index
    %c0_0 = arith.constant 0 : index
    %0 = vector.load %arg2[%c0, %c0_0] : memref<64x16xbf16, #tpu.memory_space<vmem>>, vector<64x16xbf16>
    %c0_1 = arith.constant 0 : index
    %c0_2 = arith.constant 0 : index
    %1 = vector.load %arg1[%c0_1, %c0_2] : memref<16x256xbf16, #tpu.memory_space<vmem>>, vector<16x256xbf16>
    %cst = arith.constant dense<0.000000e+00> : vector<64x256xf32>
    %2 = tpu.matmul %0, %1, %cst {dimension_numbers = #tpu.dot_dimension_numbers<[1], [0], [0], [1], [0, 0, 1, 1], [], []>} : vector<64x16xbf16>, vector<16x256xbf16>, vector<64x256xf32> -> vector<64x256xf32>
    %c0_3 = arith.constant 0 : index
    %c0_4 = arith.constant 0 : index
    %3 = vector.load %arg3[%c0_3, %c0_4] : memref<64x1xf32, #tpu.memory_space<vmem>>, vector<64x1xf32>
    %4 = vector.broadcast %3 : vector<64x1xf32> to vector<64x256xf32>
    %5 = arith.addf %2, %4 : vector<64x256xf32>
    %cst_5 = arith.constant 0.000000e+00 : f32
    %6 = vector.broadcast %cst_5 : f32 to vector<64x256xf32>
    %7 = arith.maximumf %5, %6 : vector<64x256xf32>
    %c0_6 = arith.constant 0 : index
    %c0_7 = arith.constant 0 : index
    %8 = vector.load %arg4[%c0_6, %c0_7] : memref<32x64xbf16, #tpu.memory_space<vmem>>, vector<32x64xbf16>
    %9 = arith.truncf %7 : vector<64x256xf32> to vector<64x256xbf16>
    %cst_8 = arith.constant dense<0.000000e+00> : vector<32x256xf32>
    %10 = tpu.matmul %8, %9, %cst_8 {dimension_numbers = #tpu.dot_dimension_numbers<[1], [0], [0], [1], [0, 0, 1, 1], [], []>} : vector<32x64xbf16>, vector<64x256xbf16>, vector<32x256xf32> -> vector<32x256xf32>
    %c0_9 = arith.constant 0 : index
    %c0_10 = arith.constant 0 : index
    %11 = vector.load %arg5[%c0_9, %c0_10] : memref<32x1xf32, #tpu.memory_space<vmem>>, vector<32x1xf32>
    %12 = vector.broadcast %11 : vector<32x1xf32> to vector<32x256xf32>
    %13 = arith.addf %10, %12 : vector<32x256xf32>
    %cst_11 = arith.constant 0.000000e+00 : f32
    %14 = vector.broadcast %cst_11 : f32 to vector<32x256xf32>
    %15 = arith.maximumf %13, %14 : vector<32x256xf32>
    %c0_12 = arith.constant 0 : index
    %c0_13 = arith.constant 0 : index
    %16 = vector.load %arg6[%c0_12, %c0_13] : memref<32x1xf32, #tpu.memory_space<vmem>>, vector<32x1xf32>
    %17 = vector.broadcast %16 : vector<32x1xf32> to vector<32x256xf32>
    %18 = arith.mulf %15, %17 : vector<32x256xf32>
    %cst_14 = arith.constant dense<0.000000e+00> : vector<256xf32>
    %19 = vector.multi_reduction <add>, %18, %cst_14 [0] : vector<32x256xf32> to vector<256xf32>
    %20 = vector.shape_cast %19 : vector<256xf32> to vector<1x256xf32>
    %c0_15 = arith.constant 0 : index
    %21 = memref.load %arg7[%c0_15] : memref<1xf32, #tpu.memory_space<smem>>
    %22 = vector.broadcast %21 : f32 to vector<1x256xf32>
    %23 = arith.addf %20, %22 : vector<1x256xf32>
    %cst_16 = arith.constant 5.000000e-01 : f32
    %24 = vector.broadcast %cst_16 : f32 to vector<1x256xf32>
    %25 = arith.mulf %24, %23 : vector<1x256xf32>
    %26 = math.tanh %25 : vector<1x256xf32>
    %cst_17 = arith.constant 1.000000e+00 : f32
    %27 = vector.broadcast %cst_17 : f32 to vector<1x256xf32>
    %28 = arith.addf %26, %27 : vector<1x256xf32>
    %cst_18 = arith.constant 5.000000e-01 : f32
    %29 = vector.broadcast %cst_18 : f32 to vector<1x256xf32>
    %30 = arith.mulf %29, %28 : vector<1x256xf32>
    %c0_19 = arith.constant 0 : index
    %c0_20 = arith.constant 0 : index
    %31 = vector.load %arg8[%c0_19, %c0_20] : memref<1x256xf32, #tpu.memory_space<vmem>>, vector<1x256xf32>
    tpu.vector_store %arg8[%c0_19, %c0_20], %30 {strides = array<i32>} : memref<1x256xf32, #tpu.memory_space<vmem>>, vector<1x256xf32>,
    return
  }
  func.func @transform_0(%arg0: i32) -> (i32, i32) {
    %c0_i32 = arith.constant 0 : i32
    %c0_i32_0 = arith.constant 0 : i32
    return %c0_i32, %arg0 : i32, i32
  }
  func.func @transform_1(%arg0: i32) -> (i32, i32) {
    %c0_i32 = arith.constant 0 : i32
    %c0_i32_0 = arith.constant 0 : i32
    %c0_i32_1 = arith.constant 0 : i32
    return %c0_i32, %c0_i32_0 : i32, i32
  }
  func.func @transform_2(%arg0: i32) -> (i32, i32) {
    %c0_i32 = arith.constant 0 : i32
    %c0_i32_0 = arith.constant 0 : i32
    %c0_i32_1 = arith.constant 0 : i32
    return %c0_i32, %c0_i32_0 : i32, i32
  }
  func.func @transform_3(%arg0: i32) -> (i32, i32) {
    %c0_i32 = arith.constant 0 : i32
    %c0_i32_0 = arith.constant 0 : i32
    %c0_i32_1 = arith.constant 0 : i32
    return %c0_i32, %c0_i32_0 : i32, i32
  }
  func.func @transform_4(%arg0: i32) -> (i32, i32) {
    %c0_i32 = arith.constant 0 : i32
    %c0_i32_0 = arith.constant 0 : i32
    %c0_i32_1 = arith.constant 0 : i32
    return %c0_i32, %c0_i32_0 : i32, i32
  }
  func.func @transform_5(%arg0: i32) -> (i32, i32) {
    %c0_i32 = arith.constant 0 : i32
    %c0_i32_0 = arith.constant 0 : i32
    %c0_i32_1 = arith.constant 0 : i32
    return %c0_i32, %c0_i32_0 : i32, i32
  }
  func.func @transform_6(%arg0: i32) -> i32 {
    %c0_i32 = arith.constant 0 : i32
    %c0_i32_0 = arith.constant 0 : i32
    return %c0_i32 : i32
  }
  func.func @transform_7(%arg0: i32) -> (i32, i32) {
    %c0_i32 = arith.constant 0 : i32
    %c0_i32_0 = arith.constant 0 : i32
    return %c0_i32, %arg0 : i32, i32
  }
}

</mosaic_0001>

<bundles_post_ra>
// kernel: tpu_custom_call.1
= control target key start
LH: loop header
LB: loop body
LE: loop exit
PB: predicated region body
PF: predicated region fallthrough
CT: control target
= control target key end

     0   :  { %s1139_s0 = inlined_call_operand.vmem [shape: bf16[16,512], index: 0, kind: input, shape index: {}]   ;;  %s1140_s1 = inlined_call_operand.vmem [shape: bf16[64,16], index: 1, kind: input, shape index: {}]   ;;  %s1141_s2 = inlined_call_operand.vmem [shape: f32[64,1], index: 2, kind: input, shape index: {}]   ;;  %s1142_s3 = inlined_call_operand.vmem [shape: bf16[32,64], index: 3, kind: input, shape index: {}]   ;;  %s1143_s4 = inlined_call_operand.vmem [shape: f32[32,1], index: 4, kind: input, shape index: {}]   ;;  %s1144_s5 = inlined_call_operand.vmem [shape: f32[32,1], index: 5, kind: input, shape index: {}]   ;;  %s1145_s6 = inlined_call_operand.<no memory space> [shape: f32[1], index: 6, kind: input, shape index: {}]   ;;  %s1146_s7 = inlined_call_operand.hbm [shape: f32[1,512], index: 7, kind: output, shape index: {}]  }
   0x1   :  { %12 = sst [smem:[#allocation2]] %s1145_s6 }
   0x2   :  { %13 = vsyncpa [#allocation5], 0 }
   0x3   :  { %15 = vsyncpa [#allocation5 + $0x1], 0  ;;  %s970_s26 = smov 0   ;;  %s972_s27 = smov 0  }
   0x4   :  { %s974_s28 = smov 0   ;;  %s976_s29 = smov 0  }
   0x5 LB: > { %s748_s6 = sadd.s32 4294967295, %s924_s29   ;;  %s749_s30 = sadd.s32 4294967294, %s924_s29   ;;  %s924_s29 = sphi %s976_s29, %s1152_s29   ;;  %s920_s28 = sphi %s974_s28, %s1151_s28   ;;  %s916_s27 = sphi %s972_s27, %s1150_s27   ;;  %s912_s26 = sphi %s970_s26, %s1149_s26  }
   0x6   : > { %s993_s8 = sadd.s32 1, %s924_s29   ;;  %s28_s9 = sadd.s32 1, %s920_s28 }
   0x7   : > { %s25_s10 = ssub.s32 %s924_s29, %s993_s8  ;;  %p35_p0 = scmp.ne.s32.totalorder %s920_s28, %s916_s27 }
   0x8   : > { %p26_p1 = scmp.eq.s32.totalorder %s25_s10, 0  ;;  %p36_p2 = scmp.eq.s32.totalorder %s924_s29, 0 }
   0x9   : > { %p191_p3 = scmp.eq.s32.totalorder %s748_s6, 1  ;;  %p196_p4 = scmp.ne.s32.totalorder %s916_s27, %s912_s26 }
   0xa   : > { %s1006_s11 = scalar_select %p26_p1, %s920_s28, %s28_s9  }
   0xb   : > { %p37_p5 = por %p36_p2, %p35_p0  ;;  %p1008_p6 = por %p191_p3, %p35_p0 }
   0xc   : > { %p197_p7 = scmp.eq.s32.totalorder %s749_s30, 1  ;;  %p751_p9 = scmp.ge.s32.totalorder %s924_s29, 2 }
   0xe   : > { %p1012_p8 = por %p197_p7, %p196_p4  ;;  %231 = sbr.rel (%p751_p9) target bundleno = 25 (0x19), region = 40 }
  0x13   : > { %234 = sbr.rel (!%p37_p5) target bundleno = 25 (0x19), region = 44  ;;  %s236_s14 = sand.u32 (%p37_p5), 1, %s920_s28  }
  0x14   : > { %s806_s15 = sshll.u32 (%p37_p5), %s924_s29, 3  ;;  %s752_s16 = sshll.u32 (%p37_p5), %s236_s14, 4 }
  0x15   : > { %s241_s19 = scalar_lea.vmem (%p37_p5), %s1139_s0, %s806_s15  ;;  %s238_s20 = scalar_lea.vmem (%p37_p5), [#allocation3], %s752_s16 }
  0x16   : > { %v272_v0 = vld [vmem:[%s241_s19] sm:$0xff] (%p37_p5)  ;;  %v274_v1 = vld [vmem:[%s241_s19 + $0x10] sm:$0xff] (%p37_p5) }
  0x17   : > { %273 = vst [vmem:[%s238_s20] sm:$0xff] (%p37_p5), %v272_v0 }
  0x18   : > { %275 = vst [vmem:[%s238_s20 + $0x8] sm:$0xff] %v274_v1 }
  0x19 PF: > { %p755_p10 = scmp.ge.s32.totalorder %s924_s29, 1  ;;  %p280_p11 = scmp.lt.s32.totalorder %s924_s29, 3 }
  0x1b   : > { %p281_p12 = pnand %p755_p10, %p280_p11 }
  0x1c   : > { %s1030_s23 = sand.u32 (!%p281_p12), 1, %s916_s27   ;;  %s645_s30 = sld [smem:[#allocation2]] (!%p281_p12) }
  0x1d   : > { %284 = sbr.rel (%p281_p12) target bundleno = 442 (0x1ba), region = 82  ;;  %s756_s24 = sshll.u32 (!%p281_p12), %s1030_s23, 4 }
  0x1e   : > { %s289_s9 = scalar_lea.vmem (!%p281_p12), [#allocation3], %s756_s24  ;;  %s803_s10 = sshll.u32 (!%p281_p12), %s748_s6, 1 }
  0x1f   : > { %s679_s16 = scalar_lea.hbm (!%p281_p12), %s1146_s7, %s803_s10  ;;  %s669_s6 = scalar_lea.sflag (!%p281_p12), [#allocation5], %s1030_s23 }
  0x20   : > { %s683_s19 = sshll.u32 (!%p281_p12), %s679_s16, 4  ;;  %s882_s25 = scalar_lea.hbm (!%p281_p12), %s1146_s7, 4  ;;  %s684_s19 = int_to_ptr.hbm [resolvable:$true] %s683_s19 }
  0x21   : > { %s876_s20 = sshra.s32 (!%p281_p12), %s684_s19, 4  ;;  %s877_s20 = int_to_ptr.hbm [resolvable:$true] %s876_s20 }
  0x22   : > { %v337_v2 = vld [vmem:[%s1141_s2 + $0x30] sm:$0xff]  ;;  %v926_v3 = vmov 0   ;;  %v335_v4 = vld [vmem:[%s1141_s2 + $0x20] sm:$0xff]  ;;  %v812_v6 = vld [vmem:[%s289_s9 + $0x4] sm:$0xf0]  ;;  %vm409_vm0 = vcmask 130048   ;;  %p883_p2 = scmp.lt.s32.totalorder %s877_s20, %s1146_s7 }
  0x23   : > { %855 = vset.pattern.permute.xlu0 %v926_v3  ;;  %856 = vset.pattern.permute.xlu1 %v926_v3  ;;  %v776_v5 = vld [vmem:[%s289_s9] sm:$0xf]  ;;  %v811_v7 = vld [vmem:[%s289_s9 + $0x4] sm:$0xf]  ;;  %v778_v9 = vld [vmem:[%s289_s9 + $0x8] sm:$0xf0] }
  0x24   : > { %371 = vperm.xlu0 %855, %v337_v2   ;;  %361 = vperm.xlu1 %856, %v335_v4   ;;  %v777_v8 = vor.u32 %v812_v6, %v776_v5  ;;  %v781_v10 = vor.u32 %v811_v7, %v778_v9  ;;  %v807_v11 = vld [vmem:[%s1140_s1] sm:$0xff]  ;;  %v338_v12 = vld [vmem:[%s1141_s2 + $0x38] sm:$0xff]  ;;  %v336_v13 = vld [vmem:[%s1141_s2 + $0x28] sm:$0xff]  ;;  %vm542_vm1 = vcmask 523264   ;;  %s757_s9 = sshll.u32 %s1030_s23, 1  ;;  %vm660_vm2 = vcmask 1040384  }
  0x25   : > { %857 = vset.pattern.permute.xlu2 %v926_v3  ;;  %v331_v14 = vld [vmem:[%s1141_s2] sm:$0xff]  ;;  %v332_v15 = vld [vmem:[%s1141_s2 + $0x8] sm:$0xff]  ;;  %v333_v18 = vld [vmem:[%s1141_s2 + $0x10] sm:$0xff]  ;;  %s317_s17 = scalar_lea.vmem [#allocation4], %s757_s9  ;;  %s878_s21 = scalar_lea.hbm %s877_s20, 2 }
  0x26   : > { %429 = vmatpush.bf16.msra.mxu0 %v777_v8  ;;  %458 = vmatpush.bf16.msra.mxu1 %v781_v10  ;;  %v808_v16 = vld [vmem:[%s1140_s1 + $0x8] sm:$0xff]  ;;  %v510_v19 = vld [vmem:[%s1143_s4 + $0x10] sm:$0xff]  ;;  %v595_v20 = vld [vmem:[%s1144_s5] sm:$0xff]  ;;  %s681_s18 = sshll.u32 %s317_s17, 4  ;;  %p879_p13 = scmp.ne.s32.totalorder %s877_s20, %s878_s21  ;;  %s682_s18 = int_to_ptr.vmem [resolvable:$true] %s681_s18 }
  0x27   : > { %v509_v17 = vld [vmem:[%s1143_s4 + $0x8] sm:$0xff]  ;;  %351 = vperm.xlu2 %857, %v333_v18   ;;  %v334_v21 = vld [vmem:[%s1141_s2 + $0x18] sm:$0xff]  ;;  %v809_v23 = vld [vmem:[%s1140_s1 + $0x10] sm:$0xff]  ;;  %p884_p3 = scmp.lt.s32.totalorder %s882_s25, %s878_s21 }
  0x28   : > { %v596_v22 = vld [vmem:[%s1144_s5 + $0x8] sm:$0xff]  ;;  %v598_v24 = vld [vmem:[%s1144_s5 + $0x18] sm:$0xff]  ;;  %v508_v25 = vld [vmem:[%s1143_s4] sm:$0xff]  ;;  %p880_p0 = pnand %p879_p13, %p1008_p6 }
  0x29   : > { %782 = vmatmul.msk.bf16.vlgmr.msra.gmra.mxu0 %vm409_vm0, %v807_v11  ;;  %786 = vmatmul.msk.bf16.vlgmr.msra.gmra.mxu1 %vm409_vm0, %v807_v11  ;;  %v511_v26 = vld [vmem:[%s1143_s4 + $0x18] sm:$0xff]  ;;  %v597_v28 = vld [vmem:[%s1144_s5 + $0x10] sm:$0xff]  ;;  %p885_p4 = por %p884_p3, %p883_p2 }
  0x2a   : > { %v810_v27 = vld [vmem:[%s1140_s1 + $0x18] sm:$0xff]  ;;  %p881_p1 = pneg %p880_p0 }
  0x2c   : > { %376 = vperm.xlu0 %855, %v338_v12   ;;  %366 = vperm.xlu1 %856, %v336_v13   ;;  %p886_p5 = pnand %p885_p4, %p881_p1 }
  0x2f   : > { %356 = vperm.xlu2 %857, %v334_v21  }
  0x34   : > { %341 = vperm.xlu0 %855, %v331_v14   ;;  %346 = vperm.xlu1 %856, %v332_v15  }
  0x37   : > { %514 = vperm.xlu2 %857, %v508_v25  }
  0x39   : > { %783 = vmatmul.msk.bf16.gmra.mxu0 %vm409_vm0, %v808_v16  ;;  %787 = vmatmul.msk.bf16.gmra.mxu1 %vm409_vm0, %v808_v16 }
  0x3c   : > { %519 = vperm.xlu0 %855, %v509_v17   ;;  %524 = vperm.xlu1 %856, %v510_v19  }
  0x3f   : > { %529 = vperm.xlu2 %857, %v511_v26  }
  0x44   : > { %601 = vperm.xlu0 %855, %v595_v20   ;;  %606 = vperm.xlu1 %856, %v596_v22  }
  0x47   : > { %611 = vperm.xlu2 %857, %v597_v28  }
  0x49   : > { %784 = vmatmul.msk.bf16.gmra.mxu0 %vm409_vm0, %v809_v23  ;;  %788 = vmatmul.msk.bf16.gmra.mxu1 %vm409_vm0, %v809_v23 }
  0x4c   : > { %616 = vperm.xlu0 %855, %v598_v24  }
  0x59   : > { %785 = vmatmul.msk.bf16.gmra.mxu0 %vm409_vm0, %v810_v27  ;;  %789 = vmatmul.msk.bf16.gmra.mxu1 %vm409_vm0, %v810_v27 }
  0x81   : > { %v352_v43 = vpop.permute.xlu2 %351 }
  0x89   : > { %v357_v54 = vpop.permute.xlu2 %356 }
  0x96   : > { %v362_v41 = vpop.permute.xlu1 %361  ;;  %v372_v42 = vpop.permute.xlu0 %371 }
  0x9e   : > { %v367_v46 = vpop.permute.xlu1 %366  ;;  %v377_v47 = vpop.permute.xlu0 %376 }
  0xa6   : > { %v431_v29 = vpop.f32.mrf.mxu0  ;;  %v460_v30 = vpop.f32.mrf.mxu1 }
  0xa7   : > { %v347_v2 = vpop.permute.xlu1 %346  ;;  %v342_v10 = vpop.permute.xlu0 %341 }
  0xa8   : > { %v432_v17 = vadd.f32 %v431_v29, %v342_v10  ;;  %v461_v19 = vadd.f32 %v460_v30, %v342_v10  ;;  %v814_v29 = vld [vmem:[%s1142_s3 + $0x8] sm:$0xff] }
  0xaa   : > { %v480_v25 = vmax.f32 %v432_v17, 0.0  ;;  %v481_v26 = vmax.f32 %v461_v19, 0.0 }
  0xae   : > { %v433_v31 = vpop.f32.mrf.mxu0  ;;  %v462_v32 = vpop.f32.mrf.mxu1 }
  0xaf   : > { %v434_v11 = vadd.f32 %v433_v31, %v347_v2  ;;  %v463_v14 = vadd.f32 %v462_v32, %v347_v2  ;;  %v813_v31 = vld [vmem:[%s1142_s3] sm:$0xff] }
  0xb1   : > { %v482_v21 = vmax.f32 %v434_v11, 0.0  ;;  %v483_v23 = vmax.f32 %v463_v14, 0.0 }
  0xb3   : > { %v500_v27 = vpack.c.bf16 %v482_v21, %v480_v25  ;;  %v501_v28 = vpack.c.bf16 %v483_v23, %v481_v26 }
  0xb6   : > { %v436_v33 = vpop.f32.mrf.mxu0  ;;  %v465_v34 = vpop.f32.mrf.mxu1 }
  0xb7   : > { %v437_v6 = vadd.f32 %v436_v33, %v352_v43  ;;  %v466_v8 = vadd.f32 %v465_v34, %v352_v43  ;;  %v515_v33 = vpop.permute.xlu2 %514  ;;  %v520_v34 = vpop.permute.xlu0 %519 }
  0xb9   : > { %v484_v18 = vmax.f32 %v437_v6, 0.0  ;;  %v485_v20 = vmax.f32 %v466_v8, 0.0 }
  0xbe   : > { %v438_v35 = vpop.f32.mrf.mxu0  ;;  %v467_v36 = vpop.f32.mrf.mxu1 }
  0xbf   : > { %v439_v63 = vadd.f32 %v438_v35, %v357_v54  ;;  %v468_v3 = vadd.f32 %v467_v36, %v357_v54 }
  0xc1   : > { %v486_v12 = vmax.f32 %v439_v63, 0.0  ;;  %v487_v15 = vmax.f32 %v468_v3, 0.0 }
  0xc3   : > { %v502_v22 = vpack.c.bf16 %v486_v12, %v484_v18  ;;  %v503_v24 = vpack.c.bf16 %v487_v15, %v485_v20 }
  0xc6   : > { %v441_v37 = vpop.f32.mrf.mxu0  ;;  %v470_v38 = vpop.f32.mrf.mxu1 }
  0xc7   : > { %v442_v57 = vadd.f32 %v441_v37, %v362_v41  ;;  %v471_v60 = vadd.f32 %v470_v38, %v362_v41  ;;  %v525_v37 = vpop.permute.xlu1 %524  ;;  %v530_v38 = vpop.permute.xlu2 %529 }
  0xc9   : > { %v488_v7 = vmax.f32 %v442_v57, 0.0  ;;  %v489_v9 = vmax.f32 %v471_v60, 0.0 }
  0xce   : > { %v443_v39 = vpop.f32.mrf.mxu0  ;;  %v472_v40 = vpop.f32.mrf.mxu1 }
  0xcf   : > { %v444_v51 = vadd.f32 %v443_v39, %v367_v46  ;;  %v473_v55 = vadd.f32 %v472_v40, %v367_v46 }
  0xd1   : > { %v490_v0 = vmax.f32 %v444_v51, 0.0  ;;  %v491_v4 = vmax.f32 %v473_v55, 0.0 }
  0xd3   : > { %v504_v13 = vpack.c.bf16 %v490_v0, %v488_v7  ;;  %v505_v16 = vpack.c.bf16 %v491_v4, %v489_v9 }
  0xd6   : > { %v446_v44 = vpop.f32.mrf.mxu0  ;;  %v475_v45 = vpop.f32.mrf.mxu1 }
  0xd7   : > { %v447_v48 = vadd.f32 %v446_v44, %v372_v42  ;;  %v476_v49 = vadd.f32 %v475_v45, %v372_v42  ;;  %v602_v45 = vpop.permute.xlu0 %601 }
  0xd9   : > { %v492_v58 = vmax.f32 %v447_v48, 0.0  ;;  %v493_v61 = vmax.f32 %v476_v49, 0.0 }
  0xde   : > { %v448_v50 = vpop.f32.mrf.mxu0  ;;  %v477_v53 = vpop.f32.mrf.mxu1 }
  0xdf   : > { %v449_v52 = vadd.f32 %v448_v50, %v377_v47  ;;  %v478_v56 = vadd.f32 %v477_v53, %v377_v47  ;;  %v617_v4 = vpop.permute.xlu0 %616 }
  0xe1   : > { %v494_v59 = vmax.f32 %v449_v52, 0.0  ;;  %v495_v62 = vmax.f32 %v478_v56, 0.0  ;;  %v607_v52 = vpop.permute.xlu1 %606  ;;  %v612_v56 = vpop.permute.xlu2 %611 }
  0xe3   : > { %v506_v1 = vpack.c.bf16 %v494_v59, %v492_v58  ;;  %v507_v5 = vpack.c.bf16 %v495_v62, %v493_v61 }
  0xe5   : > { %553 = vmatpush.bf16.msra.mxu2 %v506_v1  ;;  %572 = vmatpush.bf16.msra.mxu3 %v507_v5 }
  0xe9   : > { %554 = vmatpush.bf16.msra.mxu2 %v504_v13  ;;  %573 = vmatpush.bf16.msra.mxu3 %v505_v16 }
  0xed   : > { %555 = vmatpush.bf16.msra.mxu2 %v502_v22  ;;  %574 = vmatpush.bf16.msra.mxu3 %v503_v24  ;;  %v646_v22 = vstv %s645_s30 }
  0xf1   : > { %556 = vmatpush.bf16.msra.mxu2 %v500_v27  ;;  %575 = vmatpush.bf16.msra.mxu3 %v501_v28 }
  0xf4   : > { %798 = vmatmul.msk.bf16.vlgmr.msra.gmra.mxu2 %vm542_vm1, %v813_v31  ;;  %800 = vmatmul.msk.bf16.vlgmr.msra.gmra.mxu3 %vm542_vm1, %v813_v31 }
 0x104   : > { %799 = vmatmul.msk.bf16.gmra.mxu2 %vm542_vm1, %v814_v29  ;;  %801 = vmatmul.msk.bf16.gmra.mxu3 %vm542_vm1, %v814_v29 }
 0x177   : > { %v558_v30 = vpop.f32.mrf.mxu2  ;;  %v577_v32 = vpop.f32.mrf.mxu3 }
 0x178   : > { %v559_v42 = vadd.f32 %v558_v30, %v515_v33  ;;  %v578_v46 = vadd.f32 %v577_v32, %v515_v33 }
 0x17a   : > { %v587_v50 = vmax.f32 %v559_v42, 0.0  ;;  %v588_v53 = vmax.f32 %v578_v46, 0.0 }
 0x17c   : > { %v619_v59 = vmul.f32 %v602_v45, %v587_v50  ;;  %v620_v63 = vmul.f32 %v602_v45, %v588_v53 }
 0x17f   : > { %v560_v35 = vpop.f32.mrf.mxu2  ;;  %v579_v36 = vpop.f32.mrf.mxu3 }
 0x180   : > { %v561_v39 = vadd.f32 %v560_v35, %v520_v34  ;;  %v580_v40 = vadd.f32 %v579_v36, %v520_v34  ;;  %v663_v34 = vlaneseq }
 0x182   : > { %v589_v48 = vmax.f32 %v561_v39, 0.0  ;;  %v590_v49 = vmax.f32 %v580_v40, 0.0  ;;  %vm665_vm3 = vcmp.lt.s32.totalorder %v663_v34, 256 }
 0x184   : > { %v621_v55 = vmul.f32 %v607_v52, %v589_v48  ;;  %v622_v57 = vmul.f32 %v607_v52, %v590_v49 }
 0x186   : > { %v627_v2 = vadd.f32 %v621_v55, %v619_v59  ;;  %v636_v5 = vadd.f32 %v622_v57, %v620_v63 }
 0x187   : > { %v563_v41 = vpop.f32.mrf.mxu2  ;;  %v582_v44 = vpop.f32.mrf.mxu3 }
 0x188   : > { %v564_v43 = vadd.f32 %v563_v41, %v525_v37  ;;  %v583_v47 = vadd.f32 %v582_v44, %v525_v37 }
 0x18a   : > { %v591_v51 = vmax.f32 %v564_v43, 0.0  ;;  %v592_v54 = vmax.f32 %v583_v47, 0.0 }
 0x18c   : > { %v623_v60 = vmul.f32 %v612_v56, %v591_v51  ;;  %v624_v0 = vmul.f32 %v612_v56, %v592_v54 }
 0x18e   : > { %v628_v7 = vadd.f32 %v627_v2, %v623_v60  ;;  %v637_v9 = vadd.f32 %v636_v5, %v624_v0 }
 0x18f   : > { %v565_v58 = vpop.f32.mrf.mxu2  ;;  %v584_v62 = vpop.f32.mrf.mxu3 }
 0x190   : > { %v566_v61 = vadd.f32 %v565_v58, %v530_v38  ;;  %v585_v1 = vadd.f32 %v584_v62, %v530_v38 }
 0x192   : > { %v593_v3 = vmax.f32 %v566_v61, 0.0  ;;  %v594_v6 = vmax.f32 %v585_v1, 0.0 }
 0x194   : > { %v625_v8 = vmul.f32 %v617_v4, %v593_v3  ;;  %v626_v10 = vmul.f32 %v617_v4, %v594_v6 }
 0x196   : > { %v629_v11 = vadd.f32 %v628_v7, %v625_v8  ;;  %v638_v12 = vadd.f32 %v637_v9, %v626_v10 }
 0x198   : > { %v630_v13 = vrot.slane %v629_v11, 4  ;;  %v639_v14 = vrot.slane %v638_v12, 4 }
 0x19a   : > { %v631_v15 = vadd.f32 %v630_v13, %v629_v11  ;;  %v640_v16 = vadd.f32 %v639_v14, %v638_v12 }
 0x19c   : > { %v632_v17 = vrot.slane %v631_v15, 2  ;;  %v641_v18 = vrot.slane %v640_v16, 2 }
 0x19e   : > { %v633_v19 = vadd.f32 %v632_v17, %v631_v15  ;;  %v642_v20 = vadd.f32 %v641_v18, %v640_v16 }
 0x1a0   : > { %v634_v21 = vrot.slane %v633_v19, 1  ;;  %v643_v23 = vrot.slane %v642_v20, 1 }
 0x1a2   : > { %v635_v24 = vadd.f32 %v634_v21, %v633_v19  ;;  %v644_v25 = vadd.f32 %v643_v23, %v642_v20 }
 0x1a4   : > { %v647_v26 = vadd.f32 %v646_v22, %v635_v24  ;;  %v648_v27 = vadd.f32 %v646_v22, %v644_v25 }
 0x1a6   : > { %v649_v28 = vmul.f32 0.5, %v647_v26  ;;  %v650_v31 = vmul.f32 0.5, %v648_v27 }
 0x1a8   : > { %858 = vtanh.f32 %v649_v28 }
 0x1a9   : > { %860 = vtanh.f32 %v650_v31 }
 0x1ae   : > { %v859_v29 = vpop.eup %858 }
 0x1af   : > { %v861_v30 = vpop.eup %860  ;;  %v653_v32 = vadd.f32 1.0, %v859_v29 }
 0x1b0   : > { %v654_v33 = vadd.f32 1.0, %v861_v30 }
 0x1b1   : > { %v655_v36 = vmul.f32 0.5, %v653_v32 }
 0x1b2   : > { %v656_v35 = vmul.f32 0.5, %v654_v33 }
 0x1b4   : > { %v659_v37 = vrot.slane %v656_v35, 7 }
 0x1b6   : > { %v661_v38 = vsel %vm660_vm2, %v655_v36, %v659_v37 }
 0x1b7   : > { %667 = vst.msk [vmem:[%s317_s17] sm:$0x3] %vm665_vm3, %v661_v38 }
 0x1b8   : > { %889 = shalt.err (!%p886_p5)
}
 0x1b9   : > { %815 = dma.vmem_to_hbm [thread:$0]  (%p1008_p6), %s682_s18, 32, %s684_s19, %s669_s6  }
 0x1ba PF: > { %s695_s23 = sand.u32 1, %s912_s26   ;;  %p818_p7 = pnand %p751_p9, %p1012_p8 }
 0x1bb   : > { %s696_s10 = scalar_lea.sflag [#allocation5], %s695_s23 }
 0x1bc   : > { %p819_p10 = pneg %p818_p7 }
 0x1be   : > { %907 = dma.done.wait (%p819_p10), %s696_s10, 32  }
 0x1bf   : > { %909 = vsyncadd (%p819_p10), %s696_s10, 4294967264  ;;  %p18_p11 = scmp.ge.s32.totalorder %s993_s8, 4   ;;  %s1149_s26 = smov %s916_s27 }
 0x1c0   : > { %s1150_s27 = smov %s920_s28  ;;  %s1151_s28 = smov %s1006_s11 }
 0x1c1   : > { %s1152_s29 = smov %s993_s8  ;;  %20 = sbr.rel (!%p18_p11) target bundleno = 5 (0x5), region = 126 }
 0x1c6   :  { %702 = vsyncpa [#allocation5], 1 }
 0x1c7   :  { %704 = vsyncpa [#allocation5 + $0x1], 1 }

</bundles_post_ra>
